<compile_context>
chip_gen: v7x
topology: tpu7x:2x2x1
jax: 0.10.0
libtpu: 0.0.40
codegen_flags: <defaults>
</compile_context>

<pallas_src>
import jax
import jax.numpy as jnp
import numpy as np
from jax.experimental import pallas as pl
from jax.experimental.pallas import tpu as pltpu


def _round8(n):
    return ((n + 7) // 8) * 8


def _param_layout(d_theta, d_x, hidden):
    """Sublane offsets of each parameter block inside the packed buffer."""
    o_w1t = 0
    o_w1x = o_w1t + _round8(d_theta)
    o_b1 = o_w1x + _round8(d_x)
    o_w2 = o_b1 + 8
    o_b2 = o_w2 + _round8(hidden)
    o_w3 = o_b2 + 8
    rows = o_w3 + 8
    return dict(w1t=o_w1t, w1x=o_w1x, b1=o_b1, w2=o_w2, b2=o_b2, w3=o_w3,
                rows=rows)


def pack_params(params, d_theta, d_x, hidden):
    """Pack the 2-D params into one sublane-padded (rows, H) buffer; b3 -> scalar."""
    w1t, w1x, b1, w2, b2, w3_row, b3 = params

    def pad8(a):
        return jnp.pad(a, ((0, _round8(a.shape[0]) - a.shape[0]), (0, 0)))

    packed = jnp.concatenate(
        [pad8(w1t), pad8(w1x), pad8(b1), pad8(w2), pad8(b2), pad8(w3_row)],
        axis=0).astype(jnp.float32)
    lay = _param_layout(d_theta, d_x, hidden)
    assert packed.shape == (lay["rows"], hidden)
    return packed, jnp.reshape(b3, ()).astype(jnp.float32)


def _make_bnre_kernel(batch, d_theta, d_x, hidden):
    lay = _param_layout(d_theta, d_x, hidden)
    B = batch

    def kernel(scalars_ref, theta_ref, x_ref, pp_ref, out_ref):
        # ---- SMEM scalars -------------------------------------------------
        lmbda = scalars_ref[0]
        running_l = scalars_ref[1]
        running_lb = scalars_ref[2]
        is_first = scalars_ref[3]
        b3 = scalars_ref[4]

        # ---- packed-parameter views (static slices) -----------------------
        w1t = pp_ref[lay["w1t"]:lay["w1t"] + d_theta, :]      # (D_theta, H)
        w1x = pp_ref[lay["w1x"]:lay["w1x"] + d_x, :]          # (D_x, H)
        b1 = pp_ref[lay["b1"]:lay["b1"] + 1, :]               # (1, H)
        w2 = pp_ref[lay["w2"]:lay["w2"] + hidden, :]          # (H, H)
        b2 = pp_ref[lay["b2"]:lay["b2"] + 1, :]               # (1, H)
        w3 = pp_ref[lay["w3"]:lay["w3"] + 1, :]               # (1, H)

        bf = jnp.bfloat16
        # ---- shared first layer (bf16 MXU operands, f32 accumulation) -----
        xb = jnp.dot(x_ref[...].astype(bf), w1x.astype(bf),
                     preferred_element_type=jnp.float32) + b1          # (B, H)
        t1 = jnp.dot(theta_ref[...].astype(bf), w1t.astype(bf),
                     preferred_element_type=jnp.float32)               # (B, H)
        # roll(theta, 1, 0) @ W1t == roll(theta @ W1t, 1, 0): rotate AFTER the
        # matmul so the theta branch is one MXU push and theta_prime is never
        # materialized in HBM.
        t1p = pltpu.roll(t1, shift=1, axis=0)                          # (B, H)

        h = jnp.tanh(jnp.concatenate([t1 + xb, t1p + xb], axis=0))     # (2B, H)

        # ---- layers 2 & 3 on the stacked batch -----------------------------
        h = jnp.tanh(jnp.dot(h.astype(bf), w2.astype(bf),
                             preferred_element_type=jnp.float32) + b2)
        # (2B, H) x (H,) contraction as VPU mul + lane reduce (skip N=1 MXU).
        z = jnp.sum(h * w3, axis=-1, keepdims=True) + b3               # (2B, 1)
        # z[:B] = log_r(theta, x), z[B:] = log_r(theta_prime, x)

        # ---- BNRE loss terms ------------------------------------------------
        row = jax.lax.broadcasted_iota(jnp.int32, z.shape, 0)
        sign = jnp.where(row < B, 1.0, -1.0).astype(jnp.float32)
        zz = z * sign                             # [log_r ; -log_r_prime]

        # Stable logsigmoid, evaluated once on the stacked/signed logits.
        ls = jnp.minimum(zz, 0.0) - jnp.log1p(jnp.exp(-jnp.abs(zz)))
        # l = (mean(-logsigmoid(log_r)) + mean(-logsigmoid(-log_rp))) / 2
        l = -jnp.mean(ls)

        # sigmoid(zz) = exp(logsigmoid(zz));
        # sigmoid(log_r) + sigmoid(log_rp) - 1 = sig[:B] - sig[B:]
        sig = jnp.exp(ls)
        lb_mean = jnp.sum(sig * sign) * (1.0 / B)
        lb = lb_mean * lb_mean

        # ---- fused scalar epilogue (first-call vs EMA branch) ---------------
        # Forward-only: running stats are constants (PyTorch uses .detach()).
        rl_first = l + 0.001
        rlb_first = lb + 0.001
        loss_first = l + lmbda * lb

        rl_ema = 0.9 * running_l + 0.1 * l
        rlb_ema = 0.9 * running_lb + 0.1 * lb
        loss_ema = l / rl_ema + (lmbda / 10.0) * (lb / rlb_ema)

        first = is_first > 0.5
        out_ref[0] = jnp.where(first, loss_first, loss_ema)
        out_ref[1] = jnp.where(first, rl_first, rl_ema)
        out_ref[2] = jnp.where(first, rlb_first, rlb_ema)
        out_ref[3] = l
        out_ref[4] = lb

    return kernel, lay["rows"]


def build_bnre_step(batch, d_theta, d_x, hidden):
    """Returns a jitted (theta, x, packed, b3, lmbda, rl, rlb, is_first) -> 5 scalars."""
    kernel, rows = _make_bnre_kernel(batch, d_theta, d_x, hidden)

    flops = (2 * batch * d_theta * hidden          # theta @ W1t
             + 2 * batch * d_x * hidden            # x @ W1x
             + 2 * (2 * batch) * hidden * hidden   # layer 2
             + 2 * (2 * batch) * hidden            # H -> 1 projection
             + 16 * (2 * batch) * hidden)          # elementwise slack
    transcendentals = 2 * (2 * batch) * hidden + 4 * (2 * batch)
    bytes_accessed = 4 * (batch * d_theta + batch * d_x + rows * hidden + 16)

    pc = pl.pallas_call(
        kernel,
        out_shape=jax.ShapeDtypeStruct((5,), jnp.float32),
        in_specs=[
            pl.BlockSpec(memory_space=pltpu.MemorySpace.SMEM),   # scalars
            pl.BlockSpec(memory_space=pltpu.MemorySpace.VMEM),   # theta
            pl.BlockSpec(memory_space=pltpu.MemorySpace.VMEM),   # x
            pl.BlockSpec(memory_space=pltpu.MemorySpace.VMEM),   # packed params
        ],
        out_specs=pl.BlockSpec(memory_space=pltpu.MemorySpace.SMEM),
        cost_estimate=pl.CostEstimate(flops=flops,
                                      transcendentals=transcendentals,
                                      bytes_accessed=bytes_accessed),
    )

    @jax.jit
    def step(theta, x, packed, b3, lmbda, running_l, running_lb, is_first):
        scalars = jnp.stack([
            jnp.asarray(lmbda, jnp.float32),
            jnp.asarray(running_l, jnp.float32),
            jnp.asarray(running_lb, jnp.float32),
            jnp.asarray(is_first, jnp.float32),
            jnp.asarray(b3, jnp.float32),
        ])
        out = pc(scalars, theta, x, packed)
        return out[0], out[1], out[2], out[3], out[4]

    return step


class WeightedBNRELoss:
    """JAX/Pallas port of the PyTorch WeightedBNRELoss module (forward only).

    One pallas_call per step; running_l / running_lb stay on device.
    """

    def __init__(self, params, batch, d_theta, d_x, hidden, lmbda=100.0):
        self.lmbda = np.float32(lmbda)
        self.packed, self.b3 = pack_params(params, d_theta, d_x, hidden)
        self._step = build_bnre_step(batch, d_theta, d_x, hidden)
        self.running_l = None
        self.running_lb = None

    def __call__(self, theta, x):
        first = self.running_l is None or self.running_lb is None
        rl = np.float32(1.0) if first else self.running_l     # ignored when first
        rlb = np.float32(1.0) if first else self.running_lb
        loss, new_rl, new_rlb, _, _ = self._step(
            theta, x, self.packed, self.b3, self.lmbda, rl, rlb,
            np.float32(1.0) if first else np.float32(0.0))
        self.running_l = new_rl        # device scalars, no host sync
        self.running_lb = new_rlb
        return loss


def init_estimator_params(key, d_theta, d_x, hidden):
    """Deterministic MLP estimator parameters (synthetic, not a checkpoint)."""
    k1, k2, k3, k4 = jax.random.split(key, 4)
    scale = 0.1
    w1t = scale * jax.random.normal(k1, (d_theta, hidden), jnp.float32)
    w1x = scale * jax.random.normal(k2, (d_x, hidden), jnp.float32)
    b1 = jnp.zeros((1, hidden), jnp.float32)
    w2 = scale * jax.random.normal(k3, (hidden, hidden), jnp.float32)
    b2 = jnp.zeros((1, hidden), jnp.float32)
    # Final (hidden -> 1) layer stored as a row: VPU multiply + lane reduce.
    w3_row = scale * jax.random.normal(k4, (1, hidden), jnp.float32)
    b3 = jnp.zeros((1, 1), jnp.float32)
    return (w1t, w1x, b1, w2, b2, w3_row, b3)


def _reference_loss_parts(theta, x, params):
    """Pure-JAX reference mirroring the PyTorch loss (bf16 MXU operands, f32 math)."""
    w1t, w1x, b1, w2, b2, w3_row, b3 = params
    bf = jnp.bfloat16
    theta_prime = jnp.roll(theta, 1, axis=0)

    def est(t):
        h = jnp.tanh(
            jnp.dot(t.astype(bf), w1t.astype(bf), preferred_element_type=jnp.float32)
            + jnp.dot(x.astype(bf), w1x.astype(bf), preferred_element_type=jnp.float32)
            + b1)
        h = jnp.tanh(
            jnp.dot(h.astype(bf), w2.astype(bf), preferred_element_type=jnp.float32)
            + b2)
        return jnp.sum(h * w3_row, axis=-1, keepdims=True) + b3

    log_r = est(theta)
    log_rp = est(theta_prime)
    l1 = -jnp.mean(jax.nn.log_sigmoid(log_r))
    l0 = -jnp.mean(jax.nn.log_sigmoid(-log_rp))
    l = 0.5 * (l1 + l0)
    lb = jnp.square(jnp.mean(jax.nn.sigmoid(log_r) + jax.nn.sigmoid(log_rp) - 1.0))
    return l, lb


if __name__ == "__main__":
    key = jax.random.PRNGKey(0)
    k_theta, k_x, k_params = jax.random.split(key, 3)

    B, D_THETA, D_X, HIDDEN = 8, 4, 16, 32
    theta = jax.random.normal(k_theta, (B, D_THETA), jnp.float32)
    x = jax.random.normal(k_x, (B, D_X), jnp.float32)
    params = init_estimator_params(k_params, D_THETA, D_X, HIDDEN)

    # ---- kernel vs pure-JAX reference for the fused (l, lb) terms ----------
    packed, b3 = pack_params(params, D_THETA, D_X, HIDDEN)
    step = build_bnre_step(B, D_THETA, D_X, HIDDEN)
    _, _, _, l_k, lb_k = step(theta, x, packed, b3, 0.0, 1.0, 1.0, 1.0)
    l_r, lb_r = _reference_loss_parts(theta, x, params)
    np.testing.assert_allclose(np.asarray(l_k), np.asarray(l_r), rtol=2e-3, atol=1e-5)
    np.testing.assert_allclose(np.asarray(lb_k), np.asarray(lb_r), rtol=2e-3, atol=1e-5)

    # ---- module-level behavior (fused in-kernel epilogue) ------------------
    loss_mod = WeightedBNRELoss(params, B, D_THETA, D_X, HIDDEN, lmbda=100.0)
    loss0 = loss_mod(theta, x)       # first call: l + lmbda * lb
    loss1 = loss_mod(theta, x)       # second call: EMA-normalized branch
    jax.block_until_ready((loss0, loss1, loss_mod.running_l, loss_mod.running_lb))

    # Check the fused scalar epilogue against numpy recomputation from the
    # kernel's own (l, lb) — validates the first-call / EMA branch select.
    l_np = np.float32(np.asarray(l_k))
    lb_np = np.float32(np.asarray(lb_k))
    exp_loss0 = l_np + np.float32(100.0) * lb_np
    rl1 = np.float32(0.9) * (l_np + np.float32(0.001)) + np.float32(0.1) * l_np
    rlb1 = np.float32(0.9) * (lb_np + np.float32(0.001)) + np.float32(0.1) * lb_np
    exp_loss1 = l_np / rl1 + np.float32(10.0) * (lb_np / rlb1)
    np.testing.assert_allclose(np.asarray(loss0), exp_loss0, rtol=1e-4, atol=1e-5)
    np.testing.assert_allclose(np.asarray(loss1), exp_loss1, rtol=1e-4, atol=1e-5)

    print("KERNEL_OK")
</pallas_src>

<mosaic_0001>
module attributes {stable_mosaic.version = 11 : i64} {
  func.func @kernel(%arg0: memref<5xf32, #tpu.memory_space<smem>>, %arg1: memref<8x4xf32, #tpu.memory_space<vmem>>, %arg2: memref<8x16xf32, #tpu.memory_space<vmem>>, %arg3: memref<80x32xf32, #tpu.memory_space<vmem>>, %arg4: memref<5xf32, #tpu.memory_space<smem>>) attributes {dimension_semantics = [], scalar_prefetch = 0 : i64, scratch_operands = 0 : i64, tpu.core_type = #tpu.core_type<tc>} {
    %c0 = arith.constant 0 : index
    %0 = memref.load %arg0[%c0] : memref<5xf32, #tpu.memory_space<smem>>
    %c1 = arith.constant 1 : index
    %1 = memref.load %arg0[%c1] : memref<5xf32, #tpu.memory_space<smem>>
    %c2 = arith.constant 2 : index
    %2 = memref.load %arg0[%c2] : memref<5xf32, #tpu.memory_space<smem>>
    %c3 = arith.constant 3 : index
    %3 = memref.load %arg0[%c3] : memref<5xf32, #tpu.memory_space<smem>>
    %c4 = arith.constant 4 : index
    %4 = memref.load %arg0[%c4] : memref<5xf32, #tpu.memory_space<smem>>
    %c0_0 = arith.constant 0 : index
    %c0_1 = arith.constant 0 : index
    %5 = vector.load %arg3[%c0_0, %c0_1] : memref<80x32xf32, #tpu.memory_space<vmem>>, vector<4x32xf32>
    %c8 = arith.constant 8 : index
    %c0_2 = arith.constant 0 : index
    %6 = vector.load %arg3[%c8, %c0_2] : memref<80x32xf32, #tpu.memory_space<vmem>>, vector<16x32xf32>
    %c24 = arith.constant 24 : index
    %c0_3 = arith.constant 0 : index
    %7 = vector.load %arg3[%c24, %c0_3] : memref<80x32xf32, #tpu.memory_space<vmem>>, vector<1x32xf32>
    %c32 = arith.constant 32 : index
    %c0_4 = arith.constant 0 : index
    %8 = vector.load %arg3[%c32, %c0_4] : memref<80x32xf32, #tpu.memory_space<vmem>>, vector<32x32xf32>
    %c64 = arith.constant 64 : index
    %c0_5 = arith.constant 0 : index
    %9 = vector.load %arg3[%c64, %c0_5] : memref<80x32xf32, #tpu.memory_space<vmem>>, vector<1x32xf32>
    %c72 = arith.constant 72 : index
    %c0_6 = arith.constant 0 : index
    %10 = vector.load %arg3[%c72, %c0_6] : memref<80x32xf32, #tpu.memory_space<vmem>>, vector<1x32xf32>
    %c0_7 = arith.constant 0 : index
    %c0_8 = arith.constant 0 : index
    %11 = vector.load %arg2[%c0_7, %c0_8] : memref<8x16xf32, #tpu.memory_space<vmem>>, vector<8x16xf32>
    %12 = arith.truncf %11 : vector<8x16xf32> to vector<8x16xbf16>
    %13 = arith.truncf %6 : vector<16x32xf32> to vector<16x32xbf16>
    %cst = arith.constant dense<0.000000e+00> : vector<8x32xf32>
    %14 = tpu.matmul %12, %13, %cst {dimension_numbers = #tpu.dot_dimension_numbers<[1], [0], [0], [1], [0, 0, 1, 1], [], []>} : vector<8x16xbf16>, vector<16x32xbf16>, vector<8x32xf32> -> vector<8x32xf32>
    %15 = vector.broadcast %7 : vector<1x32xf32> to vector<8x32xf32>
    %16 = arith.addf %14, %15 : vector<8x32xf32>
    %c0_9 = arith.constant 0 : index
    %c0_10 = arith.constant 0 : index
    %17 = vector.load %arg1[%c0_9, %c0_10] : memref<8x4xf32, #tpu.memory_space<vmem>>, vector<8x4xf32>
    %18 = arith.truncf %17 : vector<8x4xf32> to vector<8x4xbf16>
    %19 = arith.truncf %5 : vector<4x32xf32> to vector<4x32xbf16>
    %cst_11 = arith.constant dense<0.000000e+00> : vector<8x32xf32>
    %20 = tpu.matmul %18, %19, %cst_11 {dimension_numbers = #tpu.dot_dimension_numbers<[1], [0], [0], [1], [0, 0, 1, 1], [], []>} : vector<8x4xbf16>, vector<4x32xbf16>, vector<8x32xf32> -> vector<8x32xf32>
    %c1_i32 = arith.constant 1 : i32
    %21 = tpu.dynamic_rotate %20 by %c1_i32 dim 0 : vector<8x32xf32>, i32 -> vector<8x32xf32>
    %22 = arith.addf %20, %16 : vector<8x32xf32>
    %23 = arith.addf %21, %16 : vector<8x32xf32>
    %24 = tpu.concatenate %22, %23 in 0 : vector<8x32xf32>, vector<8x32xf32> -> vector<16x32xf32>
    %25 = math.tanh %24 : vector<16x32xf32>
    %26 = arith.truncf %25 : vector<16x32xf32> to vector<16x32xbf16>
    %27 = arith.truncf %8 : vector<32x32xf32> to vector<32x32xbf16>
    %cst_12 = arith.constant dense<0.000000e+00> : vector<16x32xf32>
    %28 = tpu.matmul %26, %27, %cst_12 {dimension_numbers = #tpu.dot_dimension_numbers<[1], [0], [0], [1], [0, 0, 1, 1], [], []>} : vector<16x32xbf16>, vector<32x32xbf16>, vector<16x32xf32> -> vector<16x32xf32>
    %29 = vector.broadcast %9 : vector<1x32xf32> to vector<16x32xf32>
    %30 = arith.addf %28, %29 : vector<16x32xf32>
    %31 = math.tanh %30 : vector<16x32xf32>
    %32 = vector.broadcast %10 : vector<1x32xf32> to vector<16x32xf32>
    %33 = arith.mulf %31, %32 : vector<16x32xf32>
    %cst_13 = arith.constant dense<0.000000e+00> : vector<16xf32>
    %34 = vector.multi_reduction <add>, %33, %cst_13 [1] : vector<16x32xf32> to vector<16xf32>
    %35 = vector.shape_cast %34 : vector<16xf32> to vector<16x1xf32>
    %36 = vector.broadcast %4 : f32 to vector<16x1xf32>
    %37 = arith.addf %35, %36 : vector<16x1xf32>
    %38 = tpu.iota {dimensions = array<i32: 0>} : vector<16x1xi32>
    %c8_i32 = arith.constant 8 : i32
    %39 = vector.broadcast %c8_i32 : i32 to vector<16x1xi32>
    %40 = arith.cmpi slt, %38, %39 : vector<16x1xi32>
    %cst_14 = arith.constant 1.000000e+00 : f32
    %cst_15 = arith.constant -1.000000e+00 : f32
    %41 = vector.broadcast %cst_14 : f32 to vector<16x1xf32>
    %42 = vector.broadcast %cst_15 : f32 to vector<16x1xf32>
    %43 = arith.select %40, %41, %42 : vector<16x1xi1>, vector<16x1xf32>
    %44 = arith.mulf %37, %43 : vector<16x1xf32>
    %cst_16 = arith.constant 0.000000e+00 : f32
    %45 = vector.broadcast %cst_16 : f32 to vector<16x1xf32>
    %46 = arith.minimumf %44, %45 : vector<16x1xf32>
    %47 = math.absf %44 : vector<16x1xf32>
    %cst_17 = arith.constant 0.000000e+00 : f32
    %48 = vector.broadcast %cst_17 : f32 to vector<16x1xf32>
    %49 = arith.subf %48, %47 : vector<16x1xf32>
    %50 = math.exp %49 : vector<16x1xf32>
    %51 = math.log1p %50 : vector<16x1xf32>
    %52 = arith.subf %46, %51 : vector<16x1xf32>
    %53 = vector.shape_cast %52 : vector<16x1xf32> to vector<1x16x1xf32>
    %cst_18 = arith.constant dense<0.000000e+00> : vector<1xf32>
    %54 = vector.multi_reduction <add>, %53, %cst_18 [1, 2] : vector<1x16x1xf32> to vector<1xf32>
    %55 = vector.shape_cast %54 : vector<1xf32> to vector<1x1x1xf32>
    %56 = vector.extract %55[0, 0, 0] : f32 from vector<1x1x1xf32>
    %cst_19 = arith.constant 1.600000e+01 : f32
    %57 = arith.divf %56, %cst_19 : f32
    %cst_20 = arith.constant 0.000000e+00 : f32
    %58 = arith.subf %cst_20, %57 : f32
    %59 = math.exp %52 : vector<16x1xf32>
    %60 = arith.mulf %59, %43 : vector<16x1xf32>
    %61 = vector.shape_cast %60 : vector<16x1xf32> to vector<1x16x1xf32>
    %cst_21 = arith.constant dense<0.000000e+00> : vector<1xf32>
    %62 = vector.multi_reduction <add>, %61, %cst_21 [1, 2] : vector<1x16x1xf32> to vector<1xf32>
    %63 = vector.shape_cast %62 : vector<1xf32> to vector<1x1x1xf32>
    %64 = vector.extract %63[0, 0, 0] : f32 from vector<1x1x1xf32>
    %cst_22 = arith.constant 1.250000e-01 : f32
    %65 = arith.mulf %64, %cst_22 : f32
    %66 = arith.mulf %65, %65 : f32
    %cst_23 = arith.constant 1.000000e-03 : f32
    %67 = arith.addf %58, %cst_23 : f32
    %cst_24 = arith.constant 1.000000e-03 : f32
    %68 = arith.addf %66, %cst_24 : f32
    %69 = arith.mulf %0, %66 : f32
    %70 = arith.addf %58, %69 : f32
    %cst_25 = arith.constant 0.899999976 : f32
    %71 = arith.mulf %cst_25, %1 : f32
    %cst_26 = arith.constant 1.000000e-01 : f32
    %72 = arith.mulf %cst_26, %58 : f32
    %73 = arith.addf %71, %72 : f32
    %cst_27 = arith.constant 0.899999976 : f32
    %74 = arith.mulf %cst_27, %2 : f32
    %cst_28 = arith.constant 1.000000e-01 : f32
    %75 = arith.mulf %cst_28, %66 : f32
    %76 = arith.addf %74, %75 : f32
    %77 = arith.divf %58, %73 : f32
    %cst_29 = arith.constant 1.000000e+01 : f32
    %78 = arith.divf %0, %cst_29 : f32
    %79 = arith.divf %66, %76 : f32
    %80 = arith.mulf %78, %79 : f32
    %81 = arith.addf %77, %80 : f32
    %cst_30 = arith.constant 5.000000e-01 : f32
    %82 = arith.cmpf ogt, %3, %cst_30 : f32
    %83 = arith.select %82, %70, %81 : f32
    %c0_31 = arith.constant 0 : index
    %84 = memref.load %arg4[%c0_31] : memref<5xf32, #tpu.memory_space<smem>>
    memref.store %83, %arg4[%c0_31] : memref<5xf32, #tpu.memory_space<smem>>
    %85 = arith.select %82, %67, %73 : f32
    %c1_32 = arith.constant 1 : index
    %86 = memref.load %arg4[%c1_32] : memref<5xf32, #tpu.memory_space<smem>>
    memref.store %85, %arg4[%c1_32] : memref<5xf32, #tpu.memory_space<smem>>
    %87 = arith.select %82, %68, %76 : f32
    %c2_33 = arith.constant 2 : index
    %88 = memref.load %arg4[%c2_33] : memref<5xf32, #tpu.memory_space<smem>>
    memref.store %87, %arg4[%c2_33] : memref<5xf32, #tpu.memory_space<smem>>
    %c3_34 = arith.constant 3 : index
    %89 = memref.load %arg4[%c3_34] : memref<5xf32, #tpu.memory_space<smem>>
    memref.store %58, %arg4[%c3_34] : memref<5xf32, #tpu.memory_space<smem>>
    %c4_35 = arith.constant 4 : index
    %90 = memref.load %arg4[%c4_35] : memref<5xf32, #tpu.memory_space<smem>>
    memref.store %66, %arg4[%c4_35] : memref<5xf32, #tpu.memory_space<smem>>
    return
  }
}

</mosaic_0001>

<bundles_post_ra>
// kernel: step.1
= control target key start
LH: loop header
LB: loop body
LE: loop exit
PB: predicated region body
PF: predicated region fallthrough
CT: control target
= control target key end

     0   :  { %9 = vsyncpa [#allocation3], 0  ;;  %s543_s0 = inlined_call_operand.vmem [shape: f32[5], index: 0, kind: input, shape index: {}]   ;;  %s544_s1 = inlined_call_operand.vmem [shape: f32[8,4], index: 1, kind: input, shape index: {}]   ;;  %s545_s2 = inlined_call_operand.vmem [shape: f32[8,16], index: 2, kind: input, shape index: {}]   ;;  %s546_s3 = inlined_call_operand.vmem [shape: f32[80,32], index: 3, kind: input, shape index: {}]   ;;  %s547_s4 = inlined_call_operand.vmem [shape: f32[5], index: 4, kind: output, shape index: {}]  }
   0x1   :  { %10 = vsyncpa [#allocation4], 0  ;;  %s17_s17 = sshll.u32 %s543_s0, 4  ;;  %s18_s17 = int_to_ptr.vmem [resolvable:$true] %s17_s17 }
   0x2   :  { %s425_s18 = scalar_lea.vmem %s18_s17, 16  ;;  %p430_p1 = scmp.lt.s32.totalorder %s18_s17, %s18_s17 }
   0x3   :  { %p426_p0 = scmp.ne.s32.totalorder %s18_s17, %s425_s18  ;;  %p431_p2 = scmp.lt.s32.totalorder %s425_s18, %s425_s18 }
   0x5   :  { %p432_p3 = por %p431_p2, %p430_p1 }
   0x7   :  { %p433_p4 = pnand %p432_p3, %p426_p0 }
   0x9   :  { %436 = shalt.err (!%p433_p4)
}
   0xa   :  { %s453_s19 = smov [#allocation2]  }
   0xb   :  { %20 = dma.vmem_to_smem %s18_s17, 16, %s453_s19, [#allocation3]  }
   0xc   :  { %449 = dma.done.wait [#allocation3], 16  }
   0xd   :  { %450 = vsyncadd [#allocation3], 4294967280 }
   0xe   :  { %30 = sfence }
   0xf   :  { %v38_v0 = vld [vmem:[%s546_s3 + $0x8] sm:$0xff]  ;;  %v39_v1 = vld [vmem:[%s546_s3 + $0x10] sm:$0xff]  ;;  %v37_v2 = vld [vmem:[%s546_s3] sm:$0xf]  ;;  %vm105_vm0 = vcmask 1041408   ;;  %v454_v3 = vmov 0.0  }
  0x10   :  { %369 = vmatprep.subr.bf16.mxu0 %v454_v3  ;;  %v49_v4 = vpack.c.bf16 %v39_v1, %v38_v0  ;;  %375 = vmatprep.subr.bf16.mxu1 %v454_v3  ;;  %v100_v5 = vpack.c.bf16 %v37_v2, %v37_v2  ;;  %v47_v6 = vld [vmem:[%s545_s2] sm:$0xff]  ;;  %vm455_vm1 = vmmov 0   ;;  %vm54_vm2 = vcmask 130048   ;;  %v42_v12 = vld [vmem:[%s546_s3 + $0x28] sm:$0xff]  ;;  %v43_v13 = vld [vmem:[%s546_s3 + $0x30] sm:$0xff]  ;;  %s355_s15 = sld [smem:[#allocation2 + $0x4]] }
  0x11   :  { %v98_v7 = vld [vmem:[%s544_s1] sm:$0xff]  ;;  %371 = vmatprep.mubr.msk.bf16.mxu0 %vm455_vm1, %v454_v3  ;;  %v48_v8 = vpack.c.bf16 %v47_v6, %v47_v6  ;;  %377 = vmatprep.mubr.msk.bf16.mxu1 %vm455_vm1, %v454_v3  ;;  %vm101_vm3 = vcmask 31744   ;;  %v44_v15 = vld [vmem:[%s546_s3 + $0x38] sm:$0xff]  ;;  %vm161_vm4 = vcmask 261120   ;;  %v361_v42 = vld [vmem:[%s546_s3 + $0x48] ss:$0 sm:$0xff] }
  0x12   :  { %370 = vmatpush3.bf16.msra.mxu0 %v49_v4  ;;  %v107_v9 = vsel %vm105_vm0, %v100_v5, 0  ;;  %v99_v10 = vpack.c.bf16 %v98_v7, %v98_v7  ;;  %v41_v11 = vld [vmem:[%s546_s3 + $0x20] sm:$0xff]  ;;  %v156_v16 = vpack.c.bf16 %v44_v15, %v43_v13  ;;  %v356_v17 = vld [vmem:[%s546_s3 + $0x18] ss:$0 sm:$0xff]  ;;  %vm262_vm7 = vcmask 7168   ;;  %s524_s16 = sld [smem:[#allocation2 + $0x3]] }
  0x13   :  { %376 = vmatpush3.bf16.msra.mxu1 %v107_v9  ;;  %381 = vmatprep.subr.bf16.mxu0 %v454_v3  ;;  %v155_v14 = vpack.c.bf16 %v42_v12, %v41_v11  ;;  %v359_v33 = vld [vmem:[%s546_s3 + $0x40] ss:$0 sm:$0xff]  ;;  %s352_s3 = sld [smem:[#allocation2 + $0x1]]  ;;  %s353_s0 = sld [smem:[#allocation2 + $0x2]] }
  0x14   :  { %s32_s30 = sld [smem:[#allocation2]]  ;;  %s342_s13 = sshll.u32 %s547_s4, 4  ;;  %s343_s13 = int_to_ptr.vmem [resolvable:$true] %s342_s13 }
  0x15   :  { %372 = vmatmul.mubr.msk.bf16.vlgmr.msra.gmra.mrb[0].mxu0 %vm54_vm2, %v48_v8  ;;  %p442_p7 = scmp.lt.s32.totalorder %s343_s13, %s343_s13 }
  0x16   :  { %378 = vmatmul.mubr.msk.bf16.vlgmr.msra.gmra.mrb[0].mxu1 %vm101_vm3, %v99_v10  ;;  %385 = vmatprep.mubr.msk.bf16.mxu0 %vm455_vm1, %v454_v3  ;;  %v220_v47 = vstv %s355_s15 }
  0x17   :  { %382 = vmatpush3.bf16.msra.mxu0 %v155_v14 }
  0x18   :  { %383 = vmatprep.subr.bf16.mxu0 %v454_v3  ;;  %p322_p5 = scmp.gt.f32.partialorder %s524_s16, 0.5 }
  0x19   :  { %s303_s20 = smul.f32 0.9, %s352_s3  ;;  %s437_s3 = scalar_lea.vmem %s343_s13, 16 }
  0x1a   :  { %s306_s26 = smul.f32 0.9, %s353_s0  ;;  %p438_p6 = scmp.ne.s32.totalorder %s343_s13, %s437_s3 }
  0x1b   :  { %384 = vmatpush3.bf16.msra.mxu0 %v156_v16  ;;  %s315_s5 = smul.f32 0.1, %s32_s30  ;;  %p443_p8 = scmp.lt.s32.totalorder %s437_s3, %s437_s3 }
  0x1d   :  { %p444_p9 = por %p443_p8, %p442_p7 }
  0x1f   :  { %p445_p10 = pnand %p444_p9, %p438_p6 }
  0xe8   :  { %v92_v18 = vpop.f32.mrb[0].mxu0 }
  0xe9   :  { %v93_v19 = vadd.f32 %v356_v17, %v92_v18  ;;  %v373_v20 = vpop.f32.mrb[1].mxu0  ;;  %v143_v21 = vpop.f32.mrb[0].mxu1 }
  0xea   :  { %v149_v22 = vrot.slane %v143_v21, 7  ;;  %v95_v23 = vpop.f32.mrb[2].mxu0  ;;  %v379_v24 = vpop.f32.mrb[1].mxu1 }
  0xeb   :  { %v150_v25 = vadd.f32 %v143_v21, %v93_v19  ;;  %v374_v26 = vpop.f32.mrb[3].mxu0  ;;  %v146_v27 = vpop.f32.mrb[2].mxu1 }
  0xec   :  { %v151_v28 = vadd.f32 %v149_v22, %v93_v19  ;;  %v380_v29 = vpop.f32.mrb[3].mxu1 }
  0xed   :  { %401 = vtanh.f32 %v150_v25 }
  0xee   :  { %403 = vtanh.f32 %v151_v28 }
  0xf7   :  { %v402_v30 = vpop.eup %401 }
  0xf8   :  { %v404_v31 = vpop.eup %403 }
  0xf9   :  { %v154_v32 = vpack.c.bf16 %v404_v31, %v402_v30 }
  0xfb   :  { %386 = vmatmul.mubr.msk.bf16.vlgmr.msra.gmra.mrb[4].mxu0 %vm161_vm4, %v154_v32 }
 0x1ce   :  { %v199_v34 = vpop.f32.mrb[4].mxu0 }
 0x1cf   :  { %v200_v35 = vadd.f32 %v359_v33, %v199_v34  ;;  %v387_v36 = vpop.f32.mrb[5].mxu0 }
 0x1d0   :  { %v202_v37 = vpop.f32.mrb[6].mxu0 }
 0x1d1   :  { %v203_v38 = vadd.f32 %v359_v33, %v202_v37  ;;  %v388_v39 = vpop.f32.mrb[7].mxu0  ;;  %405 = vtanh.f32 %v200_v35 }
 0x1d3   :  { %407 = vtanh.f32 %v203_v38 }
 0x1db   :  { %v406_v40 = vpop.eup %405 }
 0x1dc   :  { %v212_v45 = vmul.f32 %v406_v40, %v361_v42 }
 0x1dd   :  { %v408_v41 = vpop.eup %407 }
 0x1de   :  { %v213_v43 = vmul.f32 %v408_v41, %v361_v42  ;;  %v214_v46 = vsel %vm161_vm4, %v212_v45, 0.0 }
 0x1e0   :  { %v217_v44 = vsel %vm161_vm4, %v213_v43, 0.0 }
 0x1e1   :  { %218 = vadd.xlane.f32.xlu0 %v217_v44 }
 0x1e5   :  { %215 = vadd.xlane.f32.xlu0 %v214_v46 }
 0x26e   :  { %v219_v48 = vpop.xlane.xlu0 %218 }
 0x26f   :  { %v222_v49 = vadd.f32 %v220_v47, %v219_v48 }
 0x271   :  { %v231_v50 = vmul.f32 -1.0, %v222_v49 }
 0x272   :  { %v216_v51 = vpop.xlane.xlu0 %215 }
 0x273   :  { %v235_v52 = vand.u32 2147483647, %v231_v50  ;;  %v221_v53 = vadd.f32 %v220_v47, %v216_v51  ;;  %v233_v9 = vmin.f32 %v231_v50, 0.0 }
 0x275   :  { %v237_v54 = vsub.f32 0.0, %v235_v52  ;;  %v234_v55 = vand.u32 2147483647, %v221_v53  ;;  %v232_v13 = vmin.f32 %v221_v53, 0.0 }
 0x277   :  { %v240_v56 = vmul.f32 1.442695, %v237_v54  ;;  %v236_v57 = vsub.f32 0.0, %v234_v55 }
 0x279   :  { %409 = vpow2.f32 %v240_v56  ;;  %v238_v58 = vmul.f32 1.442695, %v236_v57 }
 0x27b   :  { %411 = vpow2.f32 %v238_v58 }
 0x283   :  { %v410_v59 = vpop.eup %409 }
 0x284   :  { %v251_v60 = vadd.f32 1.0, %v410_v59  ;;  %v254_v63 = vmul.f32 -0.5, %v410_v59  ;;  %v257_v2 = vand.u32 2147483647, %v410_v59 }
 0x285   :  { %v412_v61 = vpop.eup %411 }
 0x286   :  { %v242_v62 = vadd.f32 1.0, %v412_v61  ;;  %413 = vlog2.f32 %v251_v60  ;;  %v245_v0 = vmul.f32 -0.5, %v412_v61  ;;  %v255_v1 = vadd.f32 1.0, %v254_v63 }
 0x287   :  { %v248_v5 = vand.u32 2147483647, %v412_v61  ;;  %vm258_vm5 = vcmp.lt.f32.partialorder %v257_v2, 0.0004427343 }
 0x288   :  { %415 = vlog2.f32 %v242_v62  ;;  %v246_v3 = vadd.f32 1.0, %v245_v0  ;;  %v256_v7 = vmul.f32 %v410_v59, %v255_v1 }
 0x289   :  { %vm249_vm6 = vcmp.lt.f32.partialorder %v248_v5, 0.0004427343 }
 0x28a   :  { %v247_v11 = vmul.f32 %v412_v61, %v246_v3 }
 0x290   :  { %v414_v4 = vpop.eup %413 }
 0x291   :  { %v253_v6 = vmul.f32 0.6931472, %v414_v4 }
 0x292   :  { %v416_v8 = vpop.eup %415 }
 0x293   :  { %v244_v10 = vmul.f32 0.6931472, %v416_v8  ;;  %v259_v12 = vsel %vm258_vm5, %v256_v7, %v253_v6 }
 0x294   :  { %v261_v14 = vsub.f32 %v233_v9, %v259_v12 }
 0x295   :  { %v250_v15 = vsel %vm249_vm6, %v247_v11, %v244_v10 }
 0x296   :  { %v260_v16 = vsub.f32 %v232_v13, %v250_v15  ;;  %v281_v17 = vmul.f32 1.442695, %v261_v14  ;;  %v264_v19 = vsel %vm262_vm7, %v261_v14, 0.0 }
 0x298   :  { %v263_v18 = vsel %vm262_vm7, %v260_v16, 0.0  ;;  %v279_v20 = vmul.f32 1.442695, %v260_v16  ;;  %417 = vpow2.f32 %v281_v17 }
 0x299   :  { %v265_v21 = vadd.f32 %v264_v19, %v263_v18 }
 0x29a   :  { %419 = vpow2.f32 %v279_v20 }
 0x29b   :  { %266 = vadd.xlane.f32.xlu1 %v265_v21 }
 0x2a2   :  { %v418_v22 = vpop.eup %417 }
 0x2a3   :  { %v284_v23 = vmul.f32 -1.0, %v418_v22 }
 0x2a4   :  { %v420_v24 = vpop.eup %419 }
 0x2a5   :  { %v285_v25 = vsel %vm262_vm7, %v420_v24, 0.0  ;;  %v286_v26 = vsel %vm262_vm7, %v284_v23, 0.0 }
 0x2a6   :  { %v287_v27 = vadd.f32 %v286_v26, %v285_v25 }
 0x2a8   :  { %288 = vadd.xlane.f32.xlu1 %v287_v27 }
 0x328   :  { %v267_v28 = vpop.xlane.xlu1 %266 }
 0x329   :  { %v268_v29 = vrot.slane %v267_v28, 4 }
 0x32b   :  { %v269_v30 = vadd.f32 %v268_v29, %v267_v28 }
 0x32d   :  { %v270_v31 = vrot.slane %v269_v30, 2 }
 0x32f   :  { %v271_v32 = vadd.f32 %v270_v31, %v269_v30 }
 0x331   :  { %v272_v33 = vrot.slane %v271_v32, 1 }
 0x333   :  { %v273_v34 = vadd.f32 %v272_v33, %v271_v32 }
 0x335   :  { %389 = vpush %v273_v34  ;;  %v289_v35 = vpop.xlane.xlu1 %288 }
 0x336   :  { %v290_v36 = vrot.slane %v289_v35, 4 }
 0x338   :  { %v291_v37 = vadd.f32 %v290_v36, %v289_v35 }
 0x33a   :  { %v292_v38 = vrot.slane %v291_v37, 2 }
 0x33c   :  { %v293_v39 = vadd.f32 %v292_v38, %v291_v37 }
 0x33e   :  { %v294_v40 = vrot.slane %v293_v39, 1 }
 0x340   :  { %v295_v41 = vadd.f32 %v294_v40, %v293_v39 }
 0x342   :  { %391 = vpush %v295_v41 }
 0x366   :  { %s390_s17 = spop %389 }
 0x367   :  { %s277_s18 = smul.f32 0.0625, %s390_s17 }
 0x369   :  { %s526_s19 = ssub.f32 0.0, %s277_s18 }
 0x36b   :  { %s299_s21 = sadd.f32 0.001, %s526_s19  ;;  %s304_s22 = smul.f32 0.1, %s526_s19 }
 0x36c   :  { %333 = sst [smem:[#allocation5 + $0x3]] %s526_s19 }
 0x36d   :  { %s305_s23 = sadd.f32 %s304_s22, %s303_s20 }
 0x36f   :  { %v309_v42 = vstv %s305_s23  ;;  %s549_s21 = smov (!%p322_p5, %s299_s21), %s305_s23 }
 0x370   :  { %421 = vrcp.f32 %v309_v42  ;;  %328 = sst [smem:[#allocation5 + $0x1]] %s549_s21 }
 0x373   :  { %s392_s24 = spop %391 }
 0x374   :  { %s297_s25 = smul.f32 0.125, %s392_s24 }
 0x376   :  { %s298_s27 = smul.f32 %s297_s25, %s297_s25 }
 0x378   :  { %s300_s28 = sadd.f32 0.001, %s298_s27  ;;  %s307_s29 = smul.f32 0.1, %s298_s27 }
 0x379   :  { %335 = sst [smem:[#allocation5 + $0x4]] %s298_s27  ;;  %s301_s6 = smul.f32 %s298_s27, %s32_s30 }
 0x37a   :  { %v422_v43 = vpop.eup %421  ;;  %s308_s2 = sadd.f32 %s307_s29, %s306_s26 }
 0x37b   :  { %393 = vpush %v422_v43  ;;  %s302_s14 = sadd.f32 %s301_s6, %s526_s19 }
 0x37c   :  { %v316_v44 = vstv %s308_s2  ;;  %s551_s28 = smov (!%p322_p5, %s300_s28), %s308_s2 }
 0x37d   :  { %423 = vrcp.f32 %v316_v44  ;;  %331 = sst [smem:[#allocation5 + $0x2]] %s551_s28 }
 0x387   :  { %v424_v45 = vpop.eup %423 }
 0x388   :  { %395 = vpush %v424_v45 }
 0x3ac   :  { %s394_s1 = spop %393 }
 0x3ad   :  { %s312_s9 = smul.f32 %s394_s1, %s526_s19 }
 0x3b9   :  { %s396_s7 = spop %395 }
 0x3ba   :  { %s319_s8 = smul.f32 %s396_s7, %s298_s27 }
 0x3bc   :  { %s320_s10 = smul.f32 %s319_s8, %s315_s5 }
 0x3be   :  { %s321_s15 = sadd.f32 %s320_s10, %s312_s9 }
 0x3c0   :  { %s553_s14 = smov (!%p322_p5, %s302_s14), %s321_s15 }
 0x3c1   :  { %325 = sst [smem:[#allocation5]] %s553_s14 }
 0x3c2   :  { %448 = shalt.err (!%p445_p10)
}
 0x3c3   :  { %s456_s17 = smov [#allocation5]  }
 0x3c4   :  { %345 = dma.smem_to_vmem %s456_s17, 16, %s343_s13, [#allocation4]  }
 0x3c5   :  { %451 = dma.done.wait [#allocation4], 16  }
 0x3c6   :  { %452 = vsyncadd [#allocation4], 4294967280 }
 0x3c7   :  { %349 = sfence }
 0x3c8   :  { %350 = vsyncpa [#allocation3], 1 }
 0x3c9   :  { %351 = vsyncpa [#allocation4], 1 }

</bundles_post_ra>
